<compile_context>
chip_gen: v7x
topology: tpu7x:2x2x1
jax: 0.10.0
libtpu: 0.0.40
codegen_flags: <defaults>
</compile_context>

<pallas_src>
import numpy as np
import jax
import jax.numpy as jnp
from jax import lax
from jax.experimental import pallas as pl
from jax.experimental.pallas import tpu as pltpu

RC = 4.0      # radial cutoff
EPS = 1e-12   # softening for rsqrt at masked (self / padded) pairs


def _property_kernel(rvec_ref, cmat_ref, amask_ref,
                     alpha_ref, rs_ref, w1t_ref, w1_ref, b1_ref, w2_ref, b2_ref,
                     e_ref, pg_ref):
    """One atom tile. Atoms are the lane axis, neighbor slot M the sublane axis.

    Forward : rho[k,a] = (sum_m cmat[k,m,a] * exp(-alpha_k (d_ma-rs_k)^2) * fc(d_ma))^2
              e_a      = w2 . tanh(W1^T rho_a + b1) + b2     (masked by atom validity)
    Backward: pg[:,m,a] = dE / d rvec[:,m,a]                 (analytic, no autodiff)
    """
    rvec = rvec_ref[...]           # (3, M, TA)  pair displacement vectors
    cmat = cmat_ref[...]           # (K, M, TA)  orbital coefficients, pair mask folded in
    amask = amask_ref[...]         # (1, TA)     1.0 for real (non-padded) atoms
    alpha = alpha_ref[...]         # (K, 1, 1)
    rs = rs_ref[...]               # (K, 1, 1)
    w1t = w1t_ref[...]             # (H, K)
    w1 = w1_ref[...]               # (K, H)
    b1 = b1_ref[...]               # (H, 1)
    w2 = w2_ref[...]               # (H, 1)
    b2 = b2_ref[...]               # (1, 1)

    # ---- forward: embedded density descriptor ----
    d2 = jnp.sum(rvec * rvec, axis=0, keepdims=True)              # (1, M, TA)
    inv_d = lax.rsqrt(d2 + EPS)                                    # single EUP op
    d = d2 * inv_d                                                 # (1, M, TA)
    u = d * (1.0 / RC)
    poly = 1.0 - u * u
    inside = jnp.where(d < RC, 1.0, 0.0)
    fc = poly * poly * inside                                      # (1, M, TA)
    dfc = -(4.0 / RC) * u * poly * inside                          # d fc / d d

    dd = d - rs                                                    # (K, M, TA)
    gauss = jnp.exp(-alpha * dd * dd)                              # (K, M, TA)
    cg = cmat * gauss                                              # shared by g and dg_dd
    g = cg * fc                                                    # (K, M, TA)
    S = jnp.sum(g, axis=1)                                         # (K, TA) sublane reduce
    rho = S * S                                                    # (K, TA) density

    # ---- forward: per-atom MLP energy ----
    pre1 = jnp.dot(w1t, rho, preferred_element_type=jnp.float32) + b1   # (H, TA)  MXU
    h1 = jnp.tanh(pre1)
    e = jnp.sum(h1 * w2, axis=0, keepdims=True) + b2               # (1, TA)  reduce
    e_ref[...] = e * amask                                         # mask padded atoms

    # ---- analytic backward: dE / d rvec ----
    dE_dpre1 = (1.0 - h1 * h1) * w2 * amask                        # (H, TA)
    dE_drho = jnp.dot(w1, dE_dpre1, preferred_element_type=jnp.float32)  # (K, TA)  MXU
    dE_dS = 2.0 * S * dE_drho                                      # (K, TA)
    dg_dd = cg * (dfc - 2.0 * alpha * dd * fc)                     # (K, M, TA)
    dE_dd = jnp.sum(dE_dS[:, None, :] * dg_dd, axis=0, keepdims=True)    # (1, M, TA)
    pg_ref[...] = dE_dd * inv_d * rvec                             # (3, M, TA) lane-dense store


def _round_up(x, m):
    return ((x + m - 1) // m) * m


def _pick_tile_and_vmem(A, M, K, H, tile_a_req, budget_bytes=36 * 1024 * 1024):
    """Choose a lane-aligned atom tile from a rough per-tile VMEM footprint."""
    def footprint(ta):
        io = 2 * ((3 + K) * M + 2) * ta          # double-buffered inputs (rvec, cmat, amask)
        io += 2 * ((3 * M) + 1) * ta             # double-buffered outputs (pg, e)
        tmp = (4 * K + 10) * M * ta              # live (K/1, M, TA) temporaries (upper bound)
        tmp += (2 * K + 4 * H + 8) * ta          # (K/H, TA) temporaries
        return 4 * (io + tmp)                    # f32 bytes

    tile_a = max(128, min(_round_up(tile_a_req, 128), _round_up(A, 128)))
    while footprint(tile_a) > budget_bytes and tile_a > 128:
        tile_a = max(128, (tile_a // 2 // 128) * 128)
    vmem_limit = int(min(56 * 1024 * 1024,
                         max(32 * 1024 * 1024, int(1.5 * footprint(tile_a)))))
    return tile_a, vmem_limit


def property_forward(cart, numatoms, species, atom_index, shifts, params,
                     tile_a=512):
    """Mirrors Property.forward: returns (varene [B], force [B, 3N]).

    tile_a: 512-1024 is a good default for v5e/v6e (128 MiB VMEM); the
    footprint-based clamp below keeps it safe for v7x (64 MiB VMEM).
    """
    B, N, _ = cart.shape
    M = atom_index.shape[-1]
    A = B * N

    c_coef = params["c_coef"]                                # (NSPEC, K)
    K = c_coef.shape[-1]
    alpha3 = params["alpha"].reshape(K, 1, 1)
    rs3 = params["rs"].reshape(K, 1, 1)
    w1 = params["w1"]                                        # (K, H)
    H = w1.shape[-1]
    w1t = w1.T                                               # (H, K) tiny duplicate
    b1c = params["b1"].reshape(H, 1)
    w2c = params["w2"].reshape(H, 1)
    b2 = params["b2"].reshape(1, 1)

    # --- glue: neighbor gathers & masks, built directly in (…, M, B, N) layout ---
    atom_ids = jnp.arange(N, dtype=atom_index.dtype)
    batch_ids = jnp.arange(B, dtype=atom_index.dtype)
    species2d = species.reshape(B, N)

    aidx_t = jnp.transpose(atom_index, (2, 0, 1))            # (M, B, N) int32 (small)
    spec_j_t = species2d[batch_ids[None, :, None], aidx_t]   # (M, B, N)

    central_valid = atom_ids[None, None, :] < numatoms[None, :, None]   # (1, B, N)
    neigh_valid = aidx_t < numatoms[None, :, None]                       # (M, B, N)
    not_self = aidx_t != atom_ids[None, None, :]                         # (M, B, N)
    pmask_t = (not_self & central_valid & neigh_valid).astype(jnp.float32)

    # cmat gathered straight from the tiny (K, NSPEC) table into (K, M, B, N);
    # pair mask folded in here (masks every pair contribution to e and pg).
    cmat_t = (c_coef.T[:, spec_j_t] * pmask_t[None]).reshape(K, M, A)

    # rvec gathered from positions pre-transposed to (3, B, N); the shifts
    # transpose fuses into the elementwise add (single HBM pass, no extra copy).
    cart_t = jnp.transpose(cart, (2, 0, 1))                  # (3, B, N) small
    pos_j_t = cart_t[:, batch_ids[None, :, None], aidx_t]    # (3, M, B, N)
    shifts_t = jnp.transpose(shifts, (3, 2, 0, 1))           # (3, M, B, N)
    rvec_t = (pos_j_t + shifts_t - cart_t[:, None, :, :]).reshape(3, M, A)

    amask_t = (atom_ids[None, :] < numatoms[:, None]).astype(jnp.float32).reshape(1, A)

    # --- tiling: atoms (lane axis) padded to a multiple of TILE_A (>=128) ---
    tile_a, vmem_limit = _pick_tile_and_vmem(A, M, K, H, tile_a)
    a_pad = _round_up(A, tile_a)
    if a_pad != A:
        pad = a_pad - A
        rvec_t = jnp.pad(rvec_t, ((0, 0), (0, 0), (0, pad)))
        cmat_t = jnp.pad(cmat_t, ((0, 0), (0, 0), (0, pad)))
        amask_t = jnp.pad(amask_t, ((0, 0), (0, pad)))

    e_atoms, pg_t = pl.pallas_call(
        _property_kernel,
        out_shape=(jax.ShapeDtypeStruct((1, a_pad), jnp.float32),
                   jax.ShapeDtypeStruct((3, M, a_pad), jnp.float32)),
        grid=(a_pad // tile_a,),
        in_specs=[
            pl.BlockSpec((3, M, tile_a), lambda i: (0, 0, i)),
            pl.BlockSpec((K, M, tile_a), lambda i: (0, 0, i)),
            pl.BlockSpec((1, tile_a), lambda i: (0, i)),
            pl.BlockSpec((K, 1, 1), lambda i: (0, 0, 0)),
            pl.BlockSpec((K, 1, 1), lambda i: (0, 0, 0)),
            pl.BlockSpec((H, K), lambda i: (0, 0)),
            pl.BlockSpec((K, H), lambda i: (0, 0)),
            pl.BlockSpec((H, 1), lambda i: (0, 0)),
            pl.BlockSpec((H, 1), lambda i: (0, 0)),
            pl.BlockSpec((1, 1), lambda i: (0, 0)),
        ],
        out_specs=(
            pl.BlockSpec((1, tile_a), lambda i: (0, i)),
            pl.BlockSpec((3, M, tile_a), lambda i: (0, 0, i)),
        ),
        compiler_params=pltpu.CompilerParams(
            dimension_semantics=("parallel",),        # independent atom tiles -> 2-TC sharding
            vmem_limit_bytes=vmem_limit),
    )(rvec_t, cmat_t, amask_t, alpha3, rs3, w1t, w1, b1c, w2c, b2)

    # --- glue: per-configuration energy (sum of per-atom outputs, dim=1) ---
    varene = jnp.sum(e_atoms[0, :A].reshape(B, N), axis=1)    # (B,)

    # --- glue: assemble atomic forces from per-pair gradients (native layout) ---
    # rvec = pos_j + shift - pos_i  =>  dE/dpos_i -= pg,  dE/dpos_j += pg
    pg = pg_t[:, :, :A].reshape(3, M, B, N)
    central = jnp.sum(pg, axis=1)                             # (3, B, N)
    seg = (batch_ids[None, :, None] * N + aidx_t).reshape(-1) # (M*B*N,)
    neighbor = jnp.stack(
        [jax.ops.segment_sum(pg[c].reshape(-1), seg, num_segments=A) for c in range(3)],
        axis=0).reshape(3, B, N)                              # O(B*N*M), no one-hot
    force = jnp.transpose(central - neighbor, (1, 2, 0)).reshape(B, 3 * N)
    return varene, force


def _reference_energy(cart, numatoms, species, atom_index, shifts, params):
    """Pure-JAX reference (same math) used to validate forces via jax.grad."""
    B, N, _ = cart.shape
    c_coef = params["c_coef"]
    alpha = params["alpha"].reshape(1, 1, 1, -1)
    rs = params["rs"].reshape(1, 1, 1, -1)
    w1, b1, w2, b2 = params["w1"], params["b1"], params["w2"], params["b2"]
    species2d = species.reshape(B, N)
    bidx = jnp.arange(B)[:, None, None]
    atom_ids = jnp.arange(N, dtype=atom_index.dtype)
    pos_j = cart[bidx, atom_index]
    rvec = pos_j + shifts - cart[:, :, None, :]
    spec_j = species2d[bidx, atom_index]
    cmat = c_coef[spec_j]
    central_valid = atom_ids[None, :, None] < numatoms[:, None, None]
    neigh_valid = atom_index < numatoms[:, None, None]
    not_self = atom_index != atom_ids[None, :, None]
    pmask = (not_self & central_valid & neigh_valid).astype(jnp.float32)[..., None]
    amask = (atom_ids[None, :] < numatoms[:, None]).astype(jnp.float32)

    d2 = jnp.sum(rvec * rvec, axis=-1, keepdims=True)
    inv_d = lax.rsqrt(d2 + EPS)
    d = d2 * inv_d
    u = d / RC
    poly = 1.0 - u * u
    inside = jnp.where(d < RC, 1.0, 0.0)
    fc = poly * poly * inside * pmask
    dd = d - rs
    gauss = jnp.exp(-alpha * dd * dd)
    g = cmat * gauss * fc
    S = jnp.sum(g, axis=2)
    rho = S * S
    h1 = jnp.tanh(jnp.einsum("bnk,kh->bnh", rho, w1) + b1)
    e = jnp.einsum("bnh,oh->bno", h1, w2) + b2
    return jnp.sum(e[..., 0] * amask, axis=1)


if __name__ == "__main__":
    B, N, M, K, H = 2, 8, 8, 8, 32     # batch, atoms, neighbor slots, nwave, hidden
    NSPEC = 3

    key = jax.random.PRNGKey(0)
    ks = jax.random.split(key, 10)
    cart = (1.5 * jax.random.normal(ks[0], (B, N, 3))).astype(jnp.float32)
    species = jax.random.randint(ks[1], (B, N), 0, NSPEC)
    numatoms = jnp.array([N, N - 2], dtype=jnp.int32)   # second config has 2 padded atoms
    # full neighbor list: slot m -> atom m (self / padded pairs masked), plus shifts
    atom_index = jnp.broadcast_to(jnp.arange(N, dtype=jnp.int32)[None, None, :], (B, N, M))
    shifts = (0.05 * jax.random.normal(ks[2], (B, N, M, 3))).astype(jnp.float32)

    params = dict(
        c_coef=(0.5 + 0.1 * jax.random.normal(ks[3], (NSPEC, K))).astype(jnp.float32),
        alpha=jnp.linspace(0.5, 1.5, K).astype(jnp.float32),
        rs=jnp.linspace(0.0, RC, K).astype(jnp.float32),
        w1=(0.2 * jax.random.normal(ks[4], (K, H))).astype(jnp.float32),
        b1=(0.1 * jax.random.normal(ks[5], (1, H))).astype(jnp.float32),
        w2=(0.2 * jax.random.normal(ks[6], (1, H))).astype(jnp.float32),
        b2=(0.1 * jax.random.normal(ks[7], (1, 1))).astype(jnp.float32),
    )

    varene, force = jax.jit(property_forward)(cart, numatoms, species,
                                              atom_index, shifts, params)
    varene, force = jax.block_until_ready((varene, force))

    # Validate against pure-JAX autodiff (same semantics as torch.autograd.grad
    # with grad_outputs=ones, summed over atoms per configuration).
    varene_ref = _reference_energy(cart, numatoms, species, atom_index, shifts, params)
    grad_cart = jax.grad(lambda c: jnp.sum(
        _reference_energy(c, numatoms, species, atom_index, shifts, params)))(cart)
    force_ref = (-grad_cart).reshape(B, -1)

    assert varene.shape == (B,) and force.shape == (B, 3 * N)
    assert np.allclose(np.asarray(varene), np.asarray(varene_ref), rtol=1e-2, atol=1e-2)
    assert np.allclose(np.asarray(force), np.asarray(force_ref), rtol=1e-2, atol=1e-2)
    print("KERNEL_OK")
</pallas_src>

<mosaic_0001>
module attributes {stable_mosaic.version = 11 : i64} {
  func.func private @main(%arg0: i32) attributes {dimension_semantics = [#tpu.dimension_semantics<core_parallel>], iteration_bounds = array<i64: 2>, tpu.core_type = #tpu.core_type<sc_scalar_subcore>, window_params = []} {
    return
  }
}

module attributes {stable_mosaic.version = 11 : i64} {
  func.func private @main(%arg0: i32) attributes {dimension_semantics = [#tpu.dimension_semantics<core_parallel>], iteration_bounds = array<i64: 2>, tpu.core_type = #tpu.core_type<sc_scalar_subcore>, window_params = []} {
    return
  }
}

module attributes {stable_mosaic.version = 11 : i64} {
  func.func @_property_kernel(%arg0: i32, %arg1: memref<3x8x128xf32, #tpu.memory_space<vmem>>, %arg2: memref<8x8x128xf32, #tpu.memory_space<vmem>>, %arg3: memref<1x128xf32, #tpu.memory_space<vmem>>, %arg4: memref<8x1x1xf32, #tpu.memory_space<vmem>>, %arg5: memref<8x1x1xf32, #tpu.memory_space<vmem>>, %arg6: memref<32x8xf32, #tpu.memory_space<vmem>>, %arg7: memref<8x32xf32, #tpu.memory_space<vmem>>, %arg8: memref<32x1xf32, #tpu.memory_space<vmem>>, %arg9: memref<32x1xf32, #tpu.memory_space<vmem>>, %arg10: memref<1x1xf32, #tpu.memory_space<vmem>>, %arg11: memref<1x128xf32, #tpu.memory_space<vmem>>, %arg12: memref<3x8x128xf32, #tpu.memory_space<vmem>>) attributes {dimension_semantics = [#tpu.dimension_semantics<parallel>], iteration_bounds = array<i64: 1>, scalar_prefetch = 0 : i64, scratch_operands = 0 : i64, tpu.core_type = #tpu.core_type<tc>, window_params = [{transform_indices = @transform_0, window_bounds = array<i64: 3, 8, 128>}, {transform_indices = @transform_1, window_bounds = array<i64: 8, 8, 128>}, {transform_indices = @transform_2, window_bounds = array<i64: 1, 128>}, {pipeline_mode = #tpu.pipeline_mode<synchronous>, transform_indices = @transform_3, window_bounds = array<i64: 8, 1, 1>}, {pipeline_mode = #tpu.pipeline_mode<synchronous>, transform_indices = @transform_4, window_bounds = array<i64: 8, 1, 1>}, {pipeline_mode = #tpu.pipeline_mode<synchronous>, transform_indices = @transform_5, window_bounds = array<i64: 32, 8>}, {pipeline_mode = #tpu.pipeline_mode<synchronous>, transform_indices = @transform_6, window_bounds = array<i64: 8, 32>}, {pipeline_mode = #tpu.pipeline_mode<synchronous>, transform_indices = @transform_7, window_bounds = array<i64: 32, 1>}, {pipeline_mode = #tpu.pipeline_mode<synchronous>, transform_indices = @transform_8, window_bounds = array<i64: 32, 1>}, {pipeline_mode = #tpu.pipeline_mode<synchronous>, transform_indices = @transform_9, window_bounds = array<i64: 1, 1>}, {transform_indices = @transform_10, window_bounds = array<i64: 1, 128>}, {transform_indices = @transform_11, window_bounds = array<i64: 3, 8, 128>}]} {
    %c0 = arith.constant 0 : index
    %c0_0 = arith.constant 0 : index
    %c0_1 = arith.constant 0 : index
    %0 = vector.load %arg1[%c0, %c0_0, %c0_1] : memref<3x8x128xf32, #tpu.memory_space<vmem>>, vector<3x8x128xf32>
    %c0_2 = arith.constant 0 : index
    %c0_3 = arith.constant 0 : index
    %c0_4 = arith.constant 0 : index
    %1 = vector.load %arg2[%c0_2, %c0_3, %c0_4] : memref<8x8x128xf32, #tpu.memory_space<vmem>>, vector<8x8x128xf32>
    %c0_5 = arith.constant 0 : index
    %c0_6 = arith.constant 0 : index
    %2 = vector.load %arg3[%c0_5, %c0_6] : memref<1x128xf32, #tpu.memory_space<vmem>>, vector<1x128xf32>
    %c0_7 = arith.constant 0 : index
    %c0_8 = arith.constant 0 : index
    %c0_9 = arith.constant 0 : index
    %3 = vector.load %arg4[%c0_7, %c0_8, %c0_9] : memref<8x1x1xf32, #tpu.memory_space<vmem>>, vector<8x1x1xf32>
    %c0_10 = arith.constant 0 : index
    %c0_11 = arith.constant 0 : index
    %c0_12 = arith.constant 0 : index
    %4 = vector.load %arg5[%c0_10, %c0_11, %c0_12] : memref<8x1x1xf32, #tpu.memory_space<vmem>>, vector<8x1x1xf32>
    %c0_13 = arith.constant 0 : index
    %c0_14 = arith.constant 0 : index
    %5 = vector.load %arg6[%c0_13, %c0_14] : memref<32x8xf32, #tpu.memory_space<vmem>>, vector<32x8xf32>
    %c0_15 = arith.constant 0 : index
    %c0_16 = arith.constant 0 : index
    %6 = vector.load %arg7[%c0_15, %c0_16] : memref<8x32xf32, #tpu.memory_space<vmem>>, vector<8x32xf32>
    %c0_17 = arith.constant 0 : index
    %c0_18 = arith.constant 0 : index
    %7 = vector.load %arg8[%c0_17, %c0_18] : memref<32x1xf32, #tpu.memory_space<vmem>>, vector<32x1xf32>
    %c0_19 = arith.constant 0 : index
    %c0_20 = arith.constant 0 : index
    %8 = vector.load %arg9[%c0_19, %c0_20] : memref<32x1xf32, #tpu.memory_space<vmem>>, vector<32x1xf32>
    %c0_21 = arith.constant 0 : index
    %c0_22 = arith.constant 0 : index
    %9 = vector.load %arg10[%c0_21, %c0_22] : memref<1x1xf32, #tpu.memory_space<vmem>>, vector<1x1xf32>
    %10 = arith.mulf %0, %0 : vector<3x8x128xf32>
    %cst = arith.constant dense<0.000000e+00> : vector<8x128xf32>
    %11 = vector.multi_reduction <add>, %10, %cst [0] : vector<3x8x128xf32> to vector<8x128xf32>
    %12 = vector.shape_cast %11 : vector<8x128xf32> to vector<1x8x128xf32>
    %cst_23 = arith.constant 9.99999996E-13 : f32
    %13 = vector.broadcast %cst_23 : f32 to vector<1x8x128xf32>
    %14 = arith.addf %12, %13 : vector<1x8x128xf32>
    %15 = math.rsqrt %14 : vector<1x8x128xf32>
    %16 = arith.mulf %12, %15 : vector<1x8x128xf32>
    %cst_24 = arith.constant 2.500000e-01 : f32
    %17 = vector.broadcast %cst_24 : f32 to vector<1x8x128xf32>
    %18 = arith.mulf %16, %17 : vector<1x8x128xf32>
    %19 = arith.mulf %18, %18 : vector<1x8x128xf32>
    %cst_25 = arith.constant 1.000000e+00 : f32
    %20 = vector.broadcast %cst_25 : f32 to vector<1x8x128xf32>
    %21 = arith.subf %20, %19 : vector<1x8x128xf32>
    %cst_26 = arith.constant 4.000000e+00 : f32
    %22 = vector.broadcast %cst_26 : f32 to vector<1x8x128xf32>
    %23 = arith.cmpf olt, %16, %22 : vector<1x8x128xf32>
    %cst_27 = arith.constant 1.000000e+00 : f32
    %cst_28 = arith.constant 0.000000e+00 : f32
    %24 = vector.broadcast %cst_27 : f32 to vector<1x8x128xf32>
    %25 = vector.broadcast %cst_28 : f32 to vector<1x8x128xf32>
    %26 = arith.select %23, %24, %25 : vector<1x8x128xi1>, vector<1x8x128xf32>
    %27 = arith.mulf %21, %21 : vector<1x8x128xf32>
    %28 = arith.mulf %27, %26 : vector<1x8x128xf32>
    %cst_29 = arith.constant -1.000000e+00 : f32
    %29 = vector.broadcast %cst_29 : f32 to vector<1x8x128xf32>
    %30 = arith.mulf %29, %18 : vector<1x8x128xf32>
    %31 = arith.mulf %30, %21 : vector<1x8x128xf32>
    %32 = arith.mulf %31, %26 : vector<1x8x128xf32>
    %33 = vector.broadcast %16 : vector<1x8x128xf32> to vector<8x8x128xf32>
    %34 = vector.broadcast %4 : vector<8x1x1xf32> to vector<8x8x128xf32>
    %35 = arith.subf %33, %34 : vector<8x8x128xf32>
    %cst_30 = arith.constant 0.000000e+00 : f32
    %36 = vector.broadcast %cst_30 : f32 to vector<8x1x1xf32>
    %37 = arith.subf %36, %3 : vector<8x1x1xf32>
    %38 = vector.broadcast %37 : vector<8x1x1xf32> to vector<8x8x128xf32>
    %39 = arith.mulf %38, %35 : vector<8x8x128xf32>
    %40 = arith.mulf %39, %35 : vector<8x8x128xf32>
    %41 = math.exp %40 : vector<8x8x128xf32>
    %42 = arith.mulf %1, %41 : vector<8x8x128xf32>
    %43 = vector.broadcast %28 : vector<1x8x128xf32> to vector<8x8x128xf32>
    %44 = arith.mulf %42, %43 : vector<8x8x128xf32>
    %cst_31 = arith.constant dense<0.000000e+00> : vector<8x128xf32>
    %45 = vector.multi_reduction <add>, %44, %cst_31 [1] : vector<8x8x128xf32> to vector<8x128xf32>
    %46 = arith.mulf %45, %45 : vector<8x128xf32>
    %cst_32 = arith.constant dense<0.000000e+00> : vector<32x128xf32>
    %47 = tpu.matmul %5, %46, %cst_32 {dimension_numbers = #tpu.dot_dimension_numbers<[1], [0], [0], [1], [0, 0, 1, 1], [], []>} : vector<32x8xf32>, vector<8x128xf32>, vector<32x128xf32> -> vector<32x128xf32>
    %48 = vector.broadcast %7 : vector<32x1xf32> to vector<32x128xf32>
    %49 = arith.addf %47, %48 : vector<32x128xf32>
    %50 = math.tanh %49 : vector<32x128xf32>
    %51 = vector.broadcast %8 : vector<32x1xf32> to vector<32x128xf32>
    %52 = arith.mulf %50, %51 : vector<32x128xf32>
    %cst_33 = arith.constant dense<0.000000e+00> : vector<128xf32>
    %53 = vector.multi_reduction <add>, %52, %cst_33 [0] : vector<32x128xf32> to vector<128xf32>
    %54 = vector.shape_cast %53 : vector<128xf32> to vector<1x128xf32>
    %55 = vector.broadcast %9 : vector<1x1xf32> to vector<1x128xf32>
    %56 = arith.addf %54, %55 : vector<1x128xf32>
    %57 = arith.mulf %56, %2 : vector<1x128xf32>
    %c0_34 = arith.constant 0 : index
    %c0_35 = arith.constant 0 : index
    %58 = vector.load %arg11[%c0_34, %c0_35] : memref<1x128xf32, #tpu.memory_space<vmem>>, vector<1x128xf32>
    tpu.vector_store %arg11[%c0_34, %c0_35], %57 {strides = array<i32>} : memref<1x128xf32, #tpu.memory_space<vmem>>, vector<1x128xf32>,
    %59 = arith.mulf %50, %50 : vector<32x128xf32>
    %cst_36 = arith.constant 1.000000e+00 : f32
    %60 = vector.broadcast %cst_36 : f32 to vector<32x128xf32>
    %61 = arith.subf %60, %59 : vector<32x128xf32>
    %62 = vector.broadcast %8 : vector<32x1xf32> to vector<32x128xf32>
    %63 = arith.mulf %61, %62 : vector<32x128xf32>
    %64 = vector.broadcast %2 : vector<1x128xf32> to vector<32x128xf32>
    %65 = arith.mulf %63, %64 : vector<32x128xf32>
    %cst_37 = arith.constant dense<0.000000e+00> : vector<8x128xf32>
    %66 = tpu.matmul %6, %65, %cst_37 {dimension_numbers = #tpu.dot_dimension_numbers<[1], [0], [0], [1], [0, 0, 1, 1], [], []>} : vector<8x32xf32>, vector<32x128xf32>, vector<8x128xf32> -> vector<8x128xf32>
    %cst_38 = arith.constant 2.000000e+00 : f32
    %67 = vector.broadcast %cst_38 : f32 to vector<8x128xf32>
    %68 = arith.mulf %67, %45 : vector<8x128xf32>
    %69 = arith.mulf %68, %66 : vector<8x128xf32>
    %cst_39 = arith.constant 2.000000e+00 : f32
    %70 = vector.broadcast %cst_39 : f32 to vector<8x1x1xf32>
    %71 = arith.mulf %70, %3 : vector<8x1x1xf32>
    %72 = vector.broadcast %71 : vector<8x1x1xf32> to vector<8x8x128xf32>
    %73 = arith.mulf %72, %35 : vector<8x8x128xf32>
    %74 = vector.broadcast %28 : vector<1x8x128xf32> to vector<8x8x128xf32>
    %75 = arith.mulf %73, %74 : vector<8x8x128xf32>
    %76 = vector.broadcast %32 : vector<1x8x128xf32> to vector<8x8x128xf32>
    %77 = arith.subf %76, %75 : vector<8x8x128xf32>
    %78 = arith.mulf %42, %77 : vector<8x8x128xf32>
    %79 = vector.shape_cast %69 : vector<8x128xf32> to vector<8x1x128xf32>
    %80 = vector.broadcast %79 : vector<8x1x128xf32> to vector<8x8x128xf32>
    %81 = arith.mulf %80, %78 : vector<8x8x128xf32>
    %cst_40 = arith.constant dense<0.000000e+00> : vector<8x128xf32>
    %82 = vector.multi_reduction <add>, %81, %cst_40 [0] : vector<8x8x128xf32> to vector<8x128xf32>
    %83 = vector.shape_cast %82 : vector<8x128xf32> to vector<1x8x128xf32>
    %84 = arith.mulf %83, %15 : vector<1x8x128xf32>
    %85 = vector.broadcast %84 : vector<1x8x128xf32> to vector<3x8x128xf32>
    %86 = arith.mulf %85, %0 : vector<3x8x128xf32>
    %c0_41 = arith.constant 0 : index
    %c0_42 = arith.constant 0 : index
    %c0_43 = arith.constant 0 : index
    %87 = vector.load %arg12[%c0_41, %c0_42, %c0_43] : memref<3x8x128xf32, #tpu.memory_space<vmem>>, vector<3x8x128xf32>
    tpu.vector_store %arg12[%c0_41, %c0_42, %c0_43], %86 {strides = array<i32>} : memref<3x8x128xf32, #tpu.memory_space<vmem>>, vector<3x8x128xf32>,
    return
  }
  func.func @transform_0(%arg0: i32) -> (i32, i32, i32) {
    %c0_i32 = arith.constant 0 : i32
    %c0_i32_0 = arith.constant 0 : i32
    %c0_i32_1 = arith.constant 0 : i32
    return %c0_i32, %c0_i32_0, %arg0 : i32, i32, i32
  }
  func.func @transform_1(%arg0: i32) -> (i32, i32, i32) {
    %c0_i32 = arith.constant 0 : i32
    %c0_i32_0 = arith.constant 0 : i32
    %c0_i32_1 = arith.constant 0 : i32
    return %c0_i32, %c0_i32_0, %arg0 : i32, i32, i32
  }
  func.func @transform_2(%arg0: i32) -> (i32, i32) {
    %c0_i32 = arith.constant 0 : i32
    %c0_i32_0 = arith.constant 0 : i32
    return %c0_i32, %arg0 : i32, i32
  }
  func.func @transform_3(%arg0: i32) -> (i32, i32, i32) {
    %c0_i32 = arith.constant 0 : i32
    %c0_i32_0 = arith.constant 0 : i32
    %c0_i32_1 = arith.constant 0 : i32
    %c0_i32_2 = arith.constant 0 : i32
    return %c0_i32, %c0_i32_0, %c0_i32_1 : i32, i32, i32
  }
  func.func @transform_4(%arg0: i32) -> (i32, i32, i32) {
    %c0_i32 = arith.constant 0 : i32
    %c0_i32_0 = arith.constant 0 : i32
    %c0_i32_1 = arith.constant 0 : i32
    %c0_i32_2 = arith.constant 0 : i32
    return %c0_i32, %c0_i32_0, %c0_i32_1 : i32, i32, i32
  }
  func.func @transform_5(%arg0: i32) -> (i32, i32) {
    %c0_i32 = arith.constant 0 : i32
    %c0_i32_0 = arith.constant 0 : i32
    %c0_i32_1 = arith.constant 0 : i32
    return %c0_i32, %c0_i32_0 : i32, i32
  }
  func.func @transform_6(%arg0: i32) -> (i32, i32) {
    %c0_i32 = arith.constant 0 : i32
    %c0_i32_0 = arith.constant 0 : i32
    %c0_i32_1 = arith.constant 0 : i32
    return %c0_i32, %c0_i32_0 : i32, i32
  }
  func.func @transform_7(%arg0: i32) -> (i32, i32) {
    %c0_i32 = arith.constant 0 : i32
    %c0_i32_0 = arith.constant 0 : i32
    %c0_i32_1 = arith.constant 0 : i32
    return %c0_i32, %c0_i32_0 : i32, i32
  }
  func.func @transform_8(%arg0: i32) -> (i32, i32) {
    %c0_i32 = arith.constant 0 : i32
    %c0_i32_0 = arith.constant 0 : i32
    %c0_i32_1 = arith.constant 0 : i32
    return %c0_i32, %c0_i32_0 : i32, i32
  }
  func.func @transform_9(%arg0: i32) -> (i32, i32) {
    %c0_i32 = arith.constant 0 : i32
    %c0_i32_0 = arith.constant 0 : i32
    %c0_i32_1 = arith.constant 0 : i32
    return %c0_i32, %c0_i32_0 : i32, i32
  }
  func.func @transform_10(%arg0: i32) -> (i32, i32) {
    %c0_i32 = arith.constant 0 : i32
    %c0_i32_0 = arith.constant 0 : i32
    return %c0_i32, %arg0 : i32, i32
  }
  func.func @transform_11(%arg0: i32) -> (i32, i32, i32) {
    %c0_i32 = arith.constant 0 : i32
    %c0_i32_0 = arith.constant 0 : i32
    %c0_i32_1 = arith.constant 0 : i32
    return %c0_i32, %c0_i32_0, %arg0 : i32, i32, i32
  }
}

</mosaic_0001>

<bundles_post_ra>
// kernel: squeeze.4
= control target key start
LH: loop header
LB: loop body
LE: loop exit
PB: predicated region body
PF: predicated region fallthrough
CT: control target
= control target key end

     0   :  { %vm7_vm0 = vcmask 64512   ;;  %s39_s0 = inlined_call_operand.vmem [shape: f32[16], index: 0, kind: input, shape index: {}]   ;;  %s40_s1 = inlined_call_operand.vmem [shape: f32[2,8], index: 1, kind: output, shape index: {}]  }
   0x1   :  { %v4_v0 = vld [vmem:[%s39_s0] sm:$0x1]  ;;  %s22_s0 = smov 120  }
   0x2   :  { %5 = vst [vmem:[#allocation1] sm:$0x1] %v4_v0 }
   0x9   :  { %v9_v1 = vld [vmem:[#allocation1] sm:$0x1]  }
   0xa   :  { %v6_v2 = vld [vmem:[#allocation1] sm:$0x1]   ;;  %10 = vrot.lane.b32.xlu0 %v9_v1, %s22_s0 }
   0xb   :  { %8 = vst.msk [vmem:[#allocation0] sm:$0x1] %vm7_vm0, %v6_v2  }
  0x7c   :  { %v11_v3 = vpop.permute.xlu0 %10  }
  0x7d   :  { %14 = vst.msk [vmem:[#allocation0 + $0x1] sm:$0x1] %vm7_vm0, %v11_v3  }
  0x84   :  { %v18_v4 = vld [vmem:[#allocation0] sm:$0x3] }
  0x85   :  { %20 = vst [vmem:[%s40_s1] sm:$0x3] %v18_v4 }

// kernel: property_forward.1
= control target key start
LH: loop header
LB: loop body
LE: loop exit
PB: predicated region body
PF: predicated region fallthrough
CT: control target
= control target key end

     0   :  { %v195_v0 = vlaneseq  ;;  %v935_v1 = vmov 0   ;;  %vm406_vm1 = vcmask 64512   ;;  %vm391_vm2 = vcmask 1041409   ;;  %s1418_s4 = inlined_call_operand.vmem [shape: f32[8,1,1], index: 4, kind: input, shape index: {}]   ;;  %s1419_s3 = inlined_call_operand.vmem [shape: f32[8,1,1], index: 3, kind: input, shape index: {}]   ;;  %s1420_s9 = inlined_call_operand.<no memory space> [shape: f32[1,1], index: 9, kind: input, shape index: {}]   ;;  %s1421_s0 = inlined_call_operand.vmem [shape: f32[3,8,128], index: 0, kind: input, shape index: {}]   ;;  %s1422_s7 = inlined_call_operand.vmem [shape: f32[32,1], index: 7, kind: input, shape index: {}]   ;;  %s1423_s8 = inlined_call_operand.vmem [shape: f32[32,1], index: 8, kind: input, shape index: {}]   ;;  %s1424_s5 = inlined_call_operand.vmem [shape: f32[32,8], index: 5, kind: input, shape index: {}]   ;;  %s1425_s1 = inlined_call_operand.vmem [shape: f32[8,8,128], index: 1, kind: input, shape index: {}]   ;;  %s1426_s2 = inlined_call_operand.vmem [shape: f32[1,128], index: 2, kind: input, shape index: {}]   ;;  %s1427_s6 = inlined_call_operand.vmem [shape: f32[8,32], index: 6, kind: input, shape index: {}]   ;;  %s1428_s10 = inlined_call_operand.vmem [shape: f32[1,128], index: 10, kind: output, shape index: {0}]   ;;  %s1429_s11 = inlined_call_operand.vmem [shape: f32[3,8,128], index: 11, kind: output, shape index: {1}]  }
   0x1   :  { %908 = vset.pattern.permute.xlu1 %v935_v1  ;;  %907 = vset.pattern.permute.xlu0 %v935_v1  ;;  %v857_v2 = vld [vmem:[%s1418_s4 + $0x2] ss:$0 sm:$0xff]  ;;  %v855_v3 = vld [vmem:[%s1418_s4] ss:$0 sm:$0xff]  ;;  %v858_v4 = vld [vmem:[%s1418_s4 + $0x3] ss:$0 sm:$0xff]  ;;  %v17_v5 = vstv %s1420_s9 }
   0x2   :  { %148 = vperm.xlu1 %908, %v857_v2   ;;  %140 = vperm.xlu0 %907, %v855_v3   ;;  %v856_v6 = vld [vmem:[%s1418_s4 + $0x1] ss:$0 sm:$0xff]  ;;  %v196_v8 = vshrl.u32 %v195_v0, 7  ;;  %18 = vst [vmem:[#allocation2] sm:$0x1] %v17_v5  ;;  %v1051_v21 = vld [vmem:[%s1421_s0 + $0x8] sm:$0xff] }
   0x3   :  { %v1017_v7 = vld [vmem:[%s1419_s3 + $0x1] sm:$0x1]  ;;  %v1023_v10 = vld [vmem:[%s1419_s3] sm:$0x1]  ;;  %v1028_v11 = vld [vmem:[%s1419_s3 + $0x2] sm:$0x1]  ;;  %v82_v26 = vmul.f32 %v1051_v21, %v1051_v21 }
   0x4   :  { %v180_v9 = vsub.f32 0.0, %v1017_v7  ;;  %v1030_v12 = vsub.s32 0, %v196_v8  ;;  %v179_v13 = vsub.f32 0.0, %v1023_v10  ;;  %v181_v16 = vsub.f32 0.0, %v1028_v11  ;;  %v1039_v17 = vld [vmem:[%s1419_s3 + $0x3] sm:$0x1] }
   0x5   :  { %v182_v19 = vsub.f32 0.0, %v1039_v17  ;;  %v1046_v20 = vld [vmem:[%s1421_s0] sm:$0xff]  ;;  %v1064_v24 = vld [vmem:[%s1421_s0 + $0x10] sm:$0xff]  ;;  %v73_v46 = vld [vmem:[%s1422_s7 + $0x8] sm:$0xff]  ;;  %v682_v55 = vmul.f32 2.0, %v1017_v7  ;;  %v681_v56 = vmul.f32 2.0, %v1023_v10 }
   0x6   :  { %152 = vperm.xlu1 %908, %v858_v4   ;;  %144 = vperm.xlu0 %907, %v856_v6   ;;  %v202_v14 = vrot.slane %v180_v9, %v1030_v12  ;;  %v198_v15 = vrot.slane %v179_v13, %v1030_v12  ;;  %v206_v18 = vrot.slane %v181_v16, %v1030_v12  ;;  %v859_v22 = vld [vmem:[%s1418_s4 + $0x4] ss:$0 sm:$0xff]  ;;  %v860_v30 = vld [vmem:[%s1418_s4 + $0x5] ss:$0 sm:$0xff]  ;;  %v861_v36 = vld [vmem:[%s1418_s4 + $0x6] ss:$0 sm:$0xff] }
   0x7   :  { %v1059_v23 = vld [vmem:[%s1419_s3 + $0x4] sm:$0x1]  ;;  %v81_v25 = vmul.f32 %v1046_v20, %v1046_v20  ;;  %v210_v27 = vrot.slane %v182_v19, %v1030_v12  ;;  %v83_v29 = vmul.f32 %v1064_v24, %v1064_v24  ;;  %v56_v31 = vld [vmem:[%s1419_s3 + $0x5] sm:$0x1]  ;;  %v58_v37 = vld [vmem:[%s1419_s3 + $0x7] sm:$0x1]  ;;  %v704_v60 = vrot.slane %v682_v55, %v1030_v12 }
   0x8   :  { %v183_v28 = vsub.f32 0.0, %v1059_v23  ;;  %v184_v34 = vsub.f32 0.0, %v56_v31  ;;  %v57_v38 = vld [vmem:[%s1419_s3 + $0x6] sm:$0x1]  ;;  %v186_v40 = vsub.f32 0.0, %v58_v37  ;;  %v75_v48 = vld [vmem:[%s1422_s7 + $0x18] sm:$0xff]  ;;  %v700_v61 = vrot.slane %v681_v56, %v1030_v12 }
   0x9   :  { %v84_v32 = vadd.f32 %v82_v26, %v81_v25  ;;  %v185_v41 = vsub.f32 0.0, %v57_v38  ;;  %v862_v43 = vld [vmem:[%s1418_s4 + $0x7] ss:$0 sm:$0xff]  ;;  %v74_v49 = vld [vmem:[%s1422_s7 + $0x10] sm:$0xff]  ;;  %v77_v51 = vld [vmem:[%s1423_s8 + $0x8] sm:$0xff]  ;;  %v684_v62 = vmul.f32 2.0, %v1039_v17 }
   0xa   :  { %232 = vperm.xlu1 %908, %v202_v14   ;;  %228 = vperm.xlu0 %907, %v198_v15   ;;  %v214_v33 = vrot.slane %v183_v28, %v1030_v12  ;;  %v218_v39 = vrot.slane %v184_v34, %v1030_v12  ;;  %v226_v44 = vrot.slane %v186_v40, %v1030_v12  ;;  %v72_v47 = vld [vmem:[%s1422_s7] sm:$0xff]  ;;  %v79_v57 = vld [vmem:[%s1423_s8 + $0x18] sm:$0xff]  ;;  %v78_v58 = vld [vmem:[%s1423_s8 + $0x10] sm:$0xff]  ;;  %v683_v63 = vmul.f32 2.0, %v1028_v11 }
   0xb   :  { %v85_v35 = vadd.f32 %v84_v32, %v83_v29  ;;  %v222_v45 = vrot.slane %v185_v41, %v1030_v12  ;;  %v76_v52 = vld [vmem:[%s1423_s8] sm:$0xff]  ;;  %v712_v2 = vrot.slane %v684_v62, %v1030_v12  ;;  %v686_v4 = vmul.f32 2.0, %v56_v31  ;;  %v80_v17 = vld [vmem:[#allocation2] sm:$0x1] }
   0xc   :  { %v708_v3 = vrot.slane %v683_v63, %v1030_v12  ;;  %v685_v5 = vmul.f32 2.0, %v1059_v23  ;;  %v936_v7 = vmov 0.0   ;;  %v688_v13 = vmul.f32 2.0, %v58_v37 }
   0xd   :  { %v86_v42 = vadd.f32 1e-12, %v85_v35  ;;  %v720_v10 = vrot.slane %v686_v4, %v1030_v12  ;;  %v687_v14 = vmul.f32 2.0, %v57_v38  ;;  %vm393_vm3 = vcmask 1042434  }
   0xe   :  { %236 = vperm.xlu1 %908, %v206_v18   ;;  %156 = vperm.xlu0 %907, %v859_v22   ;;  %v716_v11 = vrot.slane %v685_v5, %v1030_v12  ;;  %v728_v15 = vrot.slane %v688_v13, %v1030_v12  ;;  %v67_v18 = vld [vmem:[%s1424_s5] sm:$0xff]  ;;  %vm395_vm4 = vcmask 1043459   ;;  %vm397_vm5 = vcmask 1044484  }
   0xf   :  { %909 = vrsqrt.f32 %v86_v42  ;;  %v724_v16 = vrot.slane %v687_v14, %v1030_v12  ;;  %880 = vmatprep.mubr.msk.f32.mxu0 %vm406_vm1, %v67_v18  ;;  %vm399_vm6 = vcmask 1045509   ;;  %vm401_vm7 = vcmask 1046534  }
  0x10   :  { %vm403_vm8 = vcmask 1047559   ;;  %vm938_vm9 = vmmov 0   ;;  %vm575_vm10 = vcmask 261120  }
  0x11   :  { %894 = vmatprep.mubr.msk.f32.mxu1 %vm938_vm9, %v936_v7 }
  0x12   :  { %240 = vperm.xlu1 %908, %v210_v27   ;;  %160 = vperm.xlu0 %907, %v860_v30  }
  0x16   :  { %244 = vperm.xlu1 %908, %v214_v33   ;;  %164 = vperm.xlu0 %907, %v861_v36  }
  0x19   :  { %v1108_v50 = vpop.eup %909 }
  0x1a   :  { %248 = vperm.xlu1 %908, %v218_v39   ;;  %168 = vperm.xlu0 %907, %v862_v43   ;;  %v1117_v53 = vmul.f32 %v1108_v50, %v85_v35 }
  0x1c   :  { %v89_v54 = vmul.f32 0.25, %v1117_v53  ;;  %vm92_vm0 = vcmp.lt.f32.partialorder %v1117_v53, 4.0 }
  0x1d   :  { %v93_v8 = vsel %vm92_vm0, 1.0, %v936_v7  ;;  %v50_v7 = vld [vmem:[%s1426_s2] sm:$0x1] }
  0x1e   :  { %256 = vperm.xlu1 %908, %v226_v44   ;;  %252 = vperm.xlu0 %907, %v222_v45   ;;  %v90_v59 = vmul.f32 %v89_v54, %v89_v54  ;;  %v96_v1 = vmul.f32 -1.0, %v89_v54 }
  0x20   :  { %v91_v0 = vsub.f32 1.0, %v90_v59 }
  0x22   :  { %370 = vperm.xlu1 %908, %v73_v46   ;;  %365 = vperm.xlu0 %907, %v72_v47   ;;  %v97_v6 = vmul.f32 %v96_v1, %v91_v0 }
  0x24   :  { %v1137_v9 = vmul.f32 %v97_v6, %v93_v8 }
  0x26   :  { %380 = vperm.xlu1 %908, %v75_v48   ;;  %375 = vperm.xlu0 %907, %v74_v49  }
  0x2a   :  { %515 = vperm.xlu1 %908, %v77_v51   ;;  %510 = vperm.xlu0 %907, %v76_v52   ;;  %v94_v51 = vmul.f32 %v91_v0, %v91_v0 }
  0x2e   :  { %525 = vperm.xlu1 %908, %v79_v57   ;;  %520 = vperm.xlu0 %907, %v78_v58   ;;  %v43_v57 = vld [vmem:[%s1425_s1 + $0x8] sm:$0xff] }
  0x32   :  { %734 = vperm.xlu1 %908, %v704_v60   ;;  %730 = vperm.xlu0 %907, %v700_v61   ;;  %v1178_v60 = vmul.f32 %v94_v51, %v93_v8  ;;  %v42_v61 = vld [vmem:[%s1425_s1] sm:$0xff]  ;;  %v44_v8 = vld [vmem:[%s1425_s1 + $0x10] sm:$0xff] }
  0x36   :  { %742 = vperm.xlu1 %908, %v712_v2   ;;  %738 = vperm.xlu0 %907, %v708_v3  }
  0x3a   :  { %750 = vperm.xlu1 %908, %v720_v10   ;;  %746 = vperm.xlu0 %907, %v716_v11  }
  0x3e   :  { %758 = vperm.xlu1 %908, %v728_v15   ;;  %754 = vperm.xlu0 %907, %v724_v16  }
  0x42   :  { %543 = vperm.xlu0 %907, %v80_v17  }
  0x81   :  { %v149_v19 = vpop.permute.xlu1 %148  ;;  %v141_v22 = vpop.permute.xlu0 %140 }
  0x82   :  { %v1148_v26 = vsub.f32 %v1117_v53, %v141_v22  ;;  %v1156_v32 = vsub.f32 %v1117_v53, %v149_v19 }
  0x85   :  { %v153_v23 = vpop.permute.xlu1 %152  ;;  %v145_v25 = vpop.permute.xlu0 %144 }
  0x86   :  { %v1151_v27 = vsub.f32 %v1117_v53, %v145_v25  ;;  %v1162_v40 = vsub.f32 %v1117_v53, %v153_v23 }
  0x89   :  { %v233_v28 = vpop.permute.xlu1 %232  ;;  %v229_v29 = vpop.permute.xlu0 %228 }
  0x8a   :  { %v260_v30 = vmul.f32 %v233_v28, %v1151_v27  ;;  %v259_v31 = vmul.f32 %v229_v29, %v1148_v26  ;;  %v45_v28 = vld [vmem:[%s1425_s1 + $0x18] sm:$0xff] }
  0x8c   :  { %v268_v33 = vmul.f32 %v260_v30, %v1151_v27  ;;  %v267_v34 = vmul.f32 %v259_v31, %v1148_v26 }
  0x8d   :  { %v237_v35 = vpop.permute.xlu1 %236  ;;  %v157_v36 = vpop.permute.xlu0 %156 }
  0x8e   :  { %v277_v37 = vmul.f32 1.442695, %v268_v33  ;;  %v275_v38 = vmul.f32 1.442695, %v267_v34  ;;  %v261_v39 = vmul.f32 %v237_v35, %v1156_v32  ;;  %v1167_v46 = vsub.f32 %v1117_v53, %v157_v36 }
  0x90   :  { %911 = vpow2.f32 %v277_v37  ;;  %v269_v41 = vmul.f32 %v261_v39, %v1156_v32 }
  0x91   :  { %913 = vpow2.f32 %v275_v38  ;;  %v241_v42 = vpop.permute.xlu1 %240  ;;  %v161_v43 = vpop.permute.xlu0 %160 }
  0x92   :  { %v279_v44 = vmul.f32 1.442695, %v269_v41  ;;  %v262_v45 = vmul.f32 %v241_v42, %v1162_v40  ;;  %v1172_v55 = vsub.f32 %v1117_v53, %v161_v43  ;;  %v46_v43 = vld [vmem:[%s1425_s1 + $0x20] sm:$0xff] }
  0x94   :  { %915 = vpow2.f32 %v279_v44  ;;  %v270_v47 = vmul.f32 %v262_v45, %v1162_v40 }
  0x95   :  { %v245_v48 = vpop.permute.xlu1 %244  ;;  %v165_v49 = vpop.permute.xlu0 %164 }
  0x96   :  { %v281_v52 = vmul.f32 1.442695, %v270_v47  ;;  %v263_v54 = vmul.f32 %v245_v48, %v1167_v46  ;;  %v1185_v2 = vsub.f32 %v1117_v53, %v165_v49 }
  0x98   :  { %917 = vpow2.f32 %v281_v52  ;;  %v271_v56 = vmul.f32 %v263_v54, %v1167_v46 }
  0x99   :  { %v249_v58 = vpop.permute.xlu1 %248  ;;  %v169_v59 = vpop.permute.xlu0 %168 }
  0x9a   :  { %v912_v62 = vpop.eup %911  ;;  %v283_v63 = vmul.f32 1.442695, %v271_v56  ;;  %v264_v0 = vmul.f32 %v249_v58, %v1172_v55  ;;  %v1191_v5 = vsub.f32 %v1117_v53, %v169_v59 }
  0x9b   :  { %v914_v1 = vpop.eup %913  ;;  %v1187_v3 = vmul.f32 %v912_v62, %v43_v57 }
  0x9c   :  { %919 = vpow2.f32 %v283_v63  ;;  %v272_v4 = vmul.f32 %v264_v0, %v1172_v55  ;;  %v1193_v6 = vmul.f32 %v914_v1, %v42_v61  ;;  %v47_v61 = vld [vmem:[%s1425_s1 + $0x28] sm:$0xff] }
  0x9d   :  { %v257_v10 = vpop.permute.xlu1 %256  ;;  %v253_v11 = vpop.permute.xlu0 %252  ;;  %v300_v13 = vmul.f32 %v1187_v3, %v1178_v60 }
  0x9e   :  { %v916_v14 = vpop.eup %915  ;;  %v285_v15 = vmul.f32 1.442695, %v272_v4  ;;  %v266_v16 = vmul.f32 %v257_v10, %v1191_v5  ;;  %v265_v17 = vmul.f32 %v253_v11, %v1185_v2  ;;  %v299_v53 = vmul.f32 %v1193_v6, %v1178_v60 }
  0x9f   :  { %v313_v18 = vrot.slane %v300_v13, 4  ;;  %v1204_v19 = vmul.f32 %v916_v14, %v44_v8 }
  0xa0   :  { %921 = vpow2.f32 %v285_v15  ;;  %v274_v22 = vmul.f32 %v266_v16, %v1191_v5  ;;  %v273_v23 = vmul.f32 %v265_v17, %v1185_v2  ;;  %v307_v25 = vrot.slane %v299_v53, 4  ;;  %v49_v16 = vld [vmem:[%s1425_s1 + $0x38] sm:$0xff] }
  0xa1   :  { %v1211_v29 = vpop.permute.xlu1 %370  ;;  %v1213_v30 = vpop.permute.xlu0 %365  ;;  %v314_v31 = vadd.f32 %v313_v18, %v300_v13  ;;  %v301_v33 = vmul.f32 %v1204_v19, %v1178_v60 }
  0xa2   :  { %v918_v34 = vpop.eup %917  ;;  %v289_v35 = vmul.f32 1.442695, %v274_v22  ;;  %v287_v36 = vmul.f32 1.442695, %v273_v23  ;;  %v308_v37 = vadd.f32 %v307_v25, %v299_v53  ;;  %v48_v23 = vld [vmem:[%s1425_s1 + $0x30] sm:$0xff] }
  0xa3   :  { %v315_v38 = vrot.slane %v314_v31, 2  ;;  %v1217_v39 = vmul.f32 %v918_v34, %v45_v28  ;;  %v319_v41 = vrot.slane %v301_v33, 4 }
  0xa4   :  { %923 = vpow2.f32 %v289_v35  ;;  %v309_v42 = vrot.slane %v308_v37, 2 }
  0xa5   :  { %925 = vpow2.f32 %v287_v36  ;;  %v1222_v44 = vpop.permute.xlu1 %380  ;;  %v1224_v45 = vpop.permute.xlu0 %375  ;;  %v316_v47 = vadd.f32 %v315_v38, %v314_v31  ;;  %v302_v48 = vmul.f32 %v1217_v39, %v1178_v60  ;;  %v320_v49 = vadd.f32 %v319_v41, %v301_v33 }
  0xa6   :  { %v920_v51 = vpop.eup %919  ;;  %v310_v52 = vadd.f32 %v309_v42, %v308_v37 }
  0xa7   :  { %v325_v54 = vrot.slane %v302_v48, 4  ;;  %v321_v56 = vrot.slane %v320_v49, 2  ;;  %v1228_v57 = vmul.f32 %v920_v51, %v46_v43  ;;  %v317_v58 = vrot.slane %v316_v47, 1 }
  0xa8   :  { %v311_v59 = vrot.slane %v310_v52, 1 }
  0xa9   :  { %v1233_v62 = vpop.permute.xlu1 %515  ;;  %v1235_v63 = vpop.permute.xlu0 %510  ;;  %v326_v0 = vadd.f32 %v325_v54, %v302_v48  ;;  %v322_v1 = vadd.f32 %v321_v56, %v320_v49  ;;  %v303_v4 = vmul.f32 %v1228_v57, %v1178_v60  ;;  %v1241_v13 = vadd.f32 %v317_v58, %v316_v47 }
  0xaa   :  { %v922_v8 = vpop.eup %921  ;;  %v1243_v14 = vadd.f32 %v311_v59, %v310_v52 }
  0xab   :  { %v327_v10 = vrot.slane %v326_v0, 2  ;;  %v1239_v11 = vmul.f32 %v922_v8, %v47_v61  ;;  %v331_v15 = vrot.slane %v303_v4, 4  ;;  %v323_v18 = vrot.slane %v322_v1, 1 }
  0xac   :  { %v355_v38 = vmul.f32 %v1243_v14, %v1243_v14  ;;  %v356_v41 = vmul.f32 %v1241_v13, %v1241_v13 }
  0xad   :  { %v1248_v17 = vpop.permute.xlu1 %525  ;;  %v1250_v53 = vpop.permute.xlu0 %520  ;;  %v304_v22 = vmul.f32 %v1239_v11, %v1178_v60  ;;  %v332_v28 = vadd.f32 %v331_v15, %v303_v4  ;;  %v328_v33 = vadd.f32 %v327_v10, %v326_v0  ;;  %v1265_v47 = vadd.f32 %v323_v18, %v322_v1 }
  0xae   :  { %v924_v25 = vpop.eup %923  ;;  %v392_v8 = vsel %vm391_vm2, %v356_v41, %v355_v38 }
  0xaf   :  { %v926_v31 = vpop.eup %925  ;;  %v337_v34 = vrot.slane %v304_v22, 4  ;;  %v1257_v35 = vmul.f32 %v924_v25, %v49_v16  ;;  %v333_v36 = vrot.slane %v332_v28, 2  ;;  %v329_v58 = vrot.slane %v328_v33, 1 }
  0xb0   :  { %v1259_v37 = vmul.f32 %v926_v31, %v48_v23  ;;  %v357_v18 = vmul.f32 %v1265_v47, %v1265_v47 }
  0xb1   :  { %v735_v42 = vpop.permute.xlu1 %734  ;;  %v731_v43 = vpop.permute.xlu0 %730  ;;  %v338_v48 = vadd.f32 %v337_v34, %v304_v22  ;;  %v306_v49 = vmul.f32 %v1257_v35, %v1178_v60  ;;  %v334_v54 = vadd.f32 %v333_v36, %v332_v28  ;;  %v1281_v34 = vadd.f32 %v329_v58, %v328_v33 }
  0xb2   :  { %v762_v51 = vmul.f32 %v735_v42, %v1151_v27  ;;  %v761_v52 = vmul.f32 %v731_v43, %v1148_v26  ;;  %v305_v56 = vmul.f32 %v1259_v37, %v1178_v60 }
  0xb3   :  { %v339_v59 = vrot.slane %v338_v48, 2  ;;  %v349_v61 = vrot.slane %v306_v49, 4  ;;  %v335_v27 = vrot.slane %v334_v54, 1 }
  0xb4   :  { %v770_v0 = vmul.f32 %v762_v51, %v1178_v60  ;;  %v769_v1 = vmul.f32 %v761_v52, %v1178_v60  ;;  %v343_v4 = vrot.slane %v305_v56, 4 }
  0xb5   :  { %v743_v10 = vpop.permute.xlu1 %742  ;;  %v739_v15 = vpop.permute.xlu0 %738  ;;  %v340_v16 = vadd.f32 %v339_v59, %v338_v48  ;;  %v350_v26 = vadd.f32 %v349_v61, %v306_v49 }
  0xb6   :  { %v778_v22 = vsub.f32 %v1137_v9, %v770_v0  ;;  %v777_v23 = vsub.f32 %v1137_v9, %v769_v1  ;;  %v764_v25 = vmul.f32 %v743_v10, %v1162_v40  ;;  %v763_v28 = vmul.f32 %v739_v15, %v1156_v32 }
  0xb7   :  { %v344_v31 = vadd.f32 %v343_v4, %v305_v56  ;;  %v341_v36 = vrot.slane %v340_v16, 1  ;;  %v351_v38 = vrot.slane %v350_v26, 2  ;;  %v1291_v32 = vadd.f32 %v335_v27, %v334_v54 }
  0xb8   :  { %v1284_v41 = vmul.f32 %v778_v22, %v1187_v3  ;;  %v1287_v42 = vmul.f32 %v777_v23, %v1193_v6  ;;  %v772_v43 = vmul.f32 %v764_v25, %v1178_v60  ;;  %v771_v48 = vmul.f32 %v763_v28, %v1178_v60 }
  0xb9   :  { %v751_v40 = vpop.permute.xlu1 %750  ;;  %v747_v49 = vpop.permute.xlu0 %746  ;;  %v1293_v51 = vadd.f32 %v341_v36, %v340_v16  ;;  %v345_v33 = vrot.slane %v344_v31, 2  ;;  %v352_v52 = vadd.f32 %v351_v38, %v350_v26  ;;  %v358_v0 = vmul.f32 %v1281_v34, %v1281_v34 }
  0xba   :  { %v780_v56 = vsub.f32 %v1137_v9, %v772_v43  ;;  %v779_v3 = vsub.f32 %v1137_v9, %v771_v48  ;;  %v766_v58 = vmul.f32 %v751_v40, %v1172_v55  ;;  %v765_v6 = vmul.f32 %v747_v49, %v1167_v46 }
  0xbb   :  { %v346_v59 = vadd.f32 %v345_v33, %v344_v31  ;;  %v353_v61 = vrot.slane %v352_v52, 1  ;;  %v394_v54 = vsel %vm393_vm3, %v357_v18, %v392_v8  ;;  %v359_v26 = vmul.f32 %v1291_v32, %v1291_v32 }
  0xbc   :  { %v1303_v1 = vmul.f32 %v780_v56, %v1217_v39  ;;  %v1306_v4 = vmul.f32 %v779_v3, %v1204_v19  ;;  %v774_v10 = vmul.f32 %v766_v58, %v1178_v60  ;;  %v773_v15 = vmul.f32 %v765_v6, %v1178_v60  ;;  %v69_v56 = vld [vmem:[%s1424_s5 + $0x10] sm:$0xff] }
  0xbd   :  { %v759_v55 = vpop.permute.xlu1 %758  ;;  %v755_v27 = vpop.permute.xlu0 %754  ;;  %v347_v46 = vrot.slane %v346_v59, 1  ;;  %v1310_v16 = vadd.f32 %v353_v61, %v352_v52  ;;  %v360_v8 = vmul.f32 %v1293_v51, %v1293_v51  ;;  %v396_v28 = vsel %vm395_vm4, %v358_v0, %v394_v54  ;;  %v68_v52 = vld [vmem:[%s1424_s5 + $0x8] sm:$0xff] }
  0xbe   :  { %v782_v39 = vsub.f32 %v1137_v9, %v774_v10  ;;  %v781_v19 = vsub.f32 %v1137_v9, %v773_v15  ;;  %v768_v18 = vmul.f32 %v759_v55, %v1191_v5  ;;  %v767_v22 = vmul.f32 %v755_v27, %v1185_v2 }
  0xbf   :  { %v1320_v23 = vadd.f32 %v347_v46, %v346_v59  ;;  %v362_v25 = vmul.f32 %v1310_v16, %v1310_v16  ;;  %v398_v43 = vsel %vm397_vm5, %v359_v26, %v396_v28 }
  0xc0   :  { %v1326_v31 = vmul.f32 %v782_v39, %v1239_v11  ;;  %v1329_v36 = vmul.f32 %v781_v19, %v1228_v57  ;;  %v776_v38 = vmul.f32 %v768_v18, %v1178_v60  ;;  %v775_v5 = vmul.f32 %v767_v22, %v1178_v60 }
  0xc1   :  { %v361_v2 = vmul.f32 %v1320_v23, %v1320_v23  ;;  %v400_v11 = vsel %vm399_vm6, %v360_v8, %v398_v43 }
  0xc2   :  { %v784_v48 = vsub.f32 %v1137_v9, %v776_v38  ;;  %v783_v40 = vsub.f32 %v1137_v9, %v775_v5  ;;  %v70_v9 = vld [vmem:[%s1424_s5 + $0x18] sm:$0xff] }
  0xc3   :  { %v402_v49 = vsel %vm401_vm7, %v361_v2, %v400_v11 }
  0xc4   :  { %v1340_v57 = vmul.f32 %v784_v48, %v1257_v35  ;;  %v1343_v33 = vmul.f32 %v783_v40, %v1259_v37  ;;  %v404_v60 = vsel %vm403_vm8, %v362_v25, %v402_v49  ;;  %v937_v35 = vmov 0.0|0.0  }
  0xc5   :  { %878 = vmatprep.subr.mxu0 %v404_v60  ;;  %897 = vmatprep.subr.bf16.mxu1 %v937_v35 }
  0xc6   :  { %879 = vmatpush3.msra.mxu0 %v404_v60 }
  0xc7   :  { %881 = vmatmul.mubr.msk.f32.vlgmr.msra.gmra.mrb[0].mxu0 %vm406_vm1, %v68_v52 }
  0xc8   :  { %883 = vmatprep.mubr.msk.f32.mxu0 %vm406_vm1, %v69_v56 }
  0xcb   :  { %884 = vmatmul.mubr.msk.f32.gmra.mrb[2].mxu0 %vm406_vm1, %v70_v9 }
 0x19a   :  { %v882_v37 = vpop.f32.mrb[0].mxu0 }
 0x19b   :  { %v491_v3 = vadd.f32 %v882_v37, %v1211_v29  ;;  %v485_v58 = vpop.f32.mrb[1].mxu0 }
 0x19c   :  { %v486_v6 = vadd.f32 %v485_v58, %v1213_v30  ;;  %v71_v58 = vld [vmem:[%s1427_s6] sm:$0xff] }
 0x19d   :  { %927 = vtanh.f32 %v491_v3 }
 0x19e   :  { %929 = vtanh.f32 %v486_v6  ;;  %v885_v59 = vpop.f32.mrb[2].mxu0 }
 0x19f   :  { %v501_v61 = vadd.f32 %v885_v59, %v1222_v44  ;;  %v495_v0 = vpop.f32.mrb[3].mxu0  ;;  %v569_v44 = vrot.slane %v50_v7, %v1030_v12 }
 0x1a0   :  { %v496_v54 = vadd.f32 %v495_v0, %v1224_v45 }
 0x1a1   :  { %931 = vtanh.f32 %v501_v61 }
 0x1a2   :  { %933 = vtanh.f32 %v496_v54 }
 0x1a7   :  { %v928_v10 = vpop.eup %927 }
 0x1a8   :  { %v930_v15 = vpop.eup %929  ;;  %v529_v29 = vmul.f32 %v928_v10, %v1233_v62  ;;  %v554_v55 = vmul.f32 %v928_v10, %v928_v10  ;;  %v649_v10 = vmul.f32 2.0, %v1243_v14 }
 0x1a9   :  { %v528_v30 = vmul.f32 %v930_v15, %v1235_v63  ;;  %v553_v27 = vmul.f32 %v930_v15, %v930_v15  ;;  %v651_v15 = vmul.f32 2.0, %v1265_v47 }
 0x1aa   :  { %v558_v46 = vsub.f32 1.0, %v554_v55  ;;  %v653_v55 = vmul.f32 2.0, %v1291_v32 }
 0x1ab   :  { %v932_v26 = vpop.eup %931  ;;  %v532_v8 = vadd.f32 %v529_v29, %v528_v30  ;;  %v557_v45 = vsub.f32 1.0, %v553_v27  ;;  %v652_v29 = vmul.f32 2.0, %v1281_v34  ;;  %v654_v30 = vmul.f32 2.0, %v1293_v51 }
 0x1ac   :  { %v934_v39 = vpop.eup %933  ;;  %v562_v19 = vmul.f32 %v558_v46, %v1233_v62  ;;  %v556_v18 = vmul.f32 %v932_v26, %v932_v26  ;;  %v531_v2 = vmul.f32 %v932_v26, %v1248_v17  ;;  %v655_v27 = vmul.f32 2.0, %v1320_v23 }
 0x1ad   :  { %v530_v22 = vmul.f32 %v934_v39, %v1250_v53  ;;  %v561_v25 = vmul.f32 %v557_v45, %v1235_v63  ;;  %v555_v28 = vmul.f32 %v934_v39, %v934_v39 }
 0x1ae   :  { %v572_v38 = vmul.f32 %v569_v44, %v562_v19  ;;  %v560_v5 = vsub.f32 1.0, %v556_v18 }
 0x1af   :  { %v533_v43 = vadd.f32 %v532_v8, %v530_v22  ;;  %v571_v48 = vmul.f32 %v569_v44, %v561_v25  ;;  %v559_v40 = vsub.f32 1.0, %v555_v28 }
 0x1b0   :  { %v564_v11 = vmul.f32 %v560_v5, %v1248_v17  ;;  %v544_v17 = vpop.permute.xlu0 %543 }
 0x1b1   :  { %v534_v49 = vadd.f32 %v533_v43, %v531_v2  ;;  %v898_v60 = vpack.c.bf16 %v572_v38, %v571_v48  ;;  %v563_v52 = vmul.f32 %v559_v40, %v1250_v53  ;;  %v549_v53 = vrot.slane %v544_v17, %v1030_v12 }
 0x1b2   :  { %v574_v62 = vmul.f32 %v569_v44, %v564_v11 }
 0x1b3   :  { %v535_v56 = vrot.slane %v534_v49, 4  ;;  %899 = vmatpush3.bf16.msra.mxu1 %v898_v60  ;;  %v573_v9 = vmul.f32 %v569_v44, %v563_v52 }
 0x1b4   :  { %900 = vmatprep.subr.bf16.mxu1 %v937_v35  ;;  %v650_v35 = vmul.f32 2.0, %v1241_v13 }
 0x1b5   :  { %v536_v63 = vadd.f32 %v535_v56, %v534_v49  ;;  %v901_v37 = vpack.c.bf16 %v574_v62, %v573_v9 }
 0x1b7   :  { %v537_v3 = vrot.slane %v536_v63, 2  ;;  %902 = vmatpush3.bf16.msra.mxu1 %v901_v37 }
 0x1b9   :  { %v538_v6 = vadd.f32 %v537_v3, %v536_v63 }
 0x1ba   :  { %895 = vmatmul.mubr.msk.f32.vlgmr.msra.gmra.mrb[0].mxu1 %vm575_vm10, %v71_v58 }
 0x1bb   :  { %v539_v59 = vrot.slane %v538_v6, 1 }
 0x1bd   :  { %v540_v61 = vadd.f32 %v539_v59, %v538_v6 }
 0x1bf   :  { %v550_v0 = vadd.f32 %v549_v53, %v540_v61 }
 0x1c1   :  { %v551_v54 = vmul.f32 %v550_v0, %v50_v7  ;;  %v656_v7 = vmul.f32 2.0, %v1310_v16 }
 0x1c3   :  { %552 = vst [vmem:[%s1428_s10] sm:$0x1] %v551_v54 }
 0x28d   :  { %v645_v46 = vpop.f32.mrb[0].mxu1 }
 0x28e   :  { %v658_v44 = vrot.slane %v645_v46, 1  ;;  %v659_v26 = vrot.slane %v645_v46, 2  ;;  %v660_v8 = vrot.slane %v645_v46, 3  ;;  %v661_v45 = vrot.slane %v645_v46, 4  ;;  %v896_v13 = vpop.f32.mrb[1].mxu1 }
 0x28f   :  { %v662_v39 = vrot.slane %v645_v46, 5  ;;  %v663_v14 = vrot.slane %v645_v46, 6  ;;  %v664_v19 = vrot.slane %v645_v46, 7  ;;  %v673_v47 = vmul.f32 %v649_v10, %v645_v46 }
 0x290   :  { %v674_v18 = vmul.f32 %v658_v44, %v650_v35  ;;  %v675_v34 = vmul.f32 %v659_v26, %v651_v15  ;;  %v676_v22 = vmul.f32 %v660_v8, %v652_v29  ;;  %v677_v32 = vmul.f32 %v661_v45, %v653_v55 }
 0x291   :  { %v678_v25 = vmul.f32 %v662_v39, %v654_v30  ;;  %v679_v51 = vmul.f32 %v663_v14, %v655_v27  ;;  %v680_v28 = vmul.f32 %v664_v19, %v656_v7  ;;  %v796_v23 = vrot.slane %v673_v47, %v1030_v12 }
 0x292   :  { %v800_v16 = vrot.slane %v674_v18, %v1030_v12  ;;  %v804_v38 = vrot.slane %v675_v34, %v1030_v12  ;;  %v808_v5 = vrot.slane %v676_v22, %v1030_v12  ;;  %v812_v2 = vrot.slane %v677_v32, %v1030_v12 }
 0x293   :  { %v816_v43 = vrot.slane %v678_v25, %v1030_v12  ;;  %v820_v48 = vrot.slane %v679_v51, %v1030_v12  ;;  %v824_v40 = vrot.slane %v680_v28, %v1030_v12  ;;  %v825_v11 = vmul.f32 %v796_v23, %v1287_v42 }
 0x294   :  { %v826_v49 = vmul.f32 %v800_v16, %v1284_v41  ;;  %v827_v60 = vmul.f32 %v804_v38, %v1306_v4  ;;  %v828_v52 = vmul.f32 %v808_v5, %v1303_v1  ;;  %v829_v62 = vmul.f32 %v812_v2, %v1329_v36 }
 0x295   :  { %v830_v56 = vmul.f32 %v816_v43, %v1326_v31  ;;  %v831_v9 = vmul.f32 %v820_v48, %v1343_v33  ;;  %v832_v63 = vmul.f32 %v824_v40, %v1340_v57 }
 0x296   :  { %v833_v37 = vadd.f32 %v826_v49, %v825_v11 }
 0x298   :  { %v834_v3 = vadd.f32 %v833_v37, %v827_v60 }
 0x29a   :  { %v835_v58 = vadd.f32 %v834_v3, %v828_v52 }
 0x29c   :  { %v836_v12 = vadd.f32 %v835_v58, %v829_v62 }
 0x29e   :  { %v837_v6 = vadd.f32 %v836_v12, %v830_v56 }
 0x2a0   :  { %v838_v42 = vadd.f32 %v837_v6, %v831_v9 }
 0x2a2   :  { %v839_v17 = vadd.f32 %v838_v42, %v832_v63 }
 0x2a4   :  { %v840_v41 = vmul.f32 %v1108_v50, %v839_v17 }
 0x2a6   :  { %v841_v4 = vmul.f32 %v840_v41, %v1046_v20  ;;  %v842_v1 = vmul.f32 %v840_v41, %v1051_v21  ;;  %v843_v36 = vmul.f32 %v840_v41, %v1064_v24 }
 0x2a8   :  { %844 = vst [vmem:[%s1429_s11] sm:$0xff] %v841_v4  ;;  %845 = vst [vmem:[%s1429_s11 + $0x8] sm:$0xff] %v842_v1 }
 0x2a9   :  { %846 = vst [vmem:[%s1429_s11 + $0x10] sm:$0xff] %v843_v36 }

</bundles_post_ra>
